<compile_context>
chip_gen: v6e
topology: v6e:2x2x1
jax: 0.10.0
libtpu: 0.0.40
codegen_flags: <defaults>
</compile_context>

<pallas_src>
import functools

import jax
import jax.numpy as jnp
from jax.experimental import pallas as pl
from jax.experimental.pallas import tpu as pltpu

LN_EPS = 1e-5                      # torch.nn.LayerNorm default
_VMEM_LIMIT = 32 * 1024 * 1024     # explicit scoped-VMEM limit (safe on v5e/v6e/v7x)


def _round_up(x, m):
    return ((x + m - 1) // m) * m


def _choose_tile_n(n, s, din, d_out, dproj, wv):
    """Pick the row-tile size and the (possibly padded) row count.

    Preference order:
      1) grid = 1 (tile_n = N) whenever the whole problem fits the VMEM budget
         — single-TC v5e/v6e sweet spot, avoids per-step overhead for small N.
      2) a divisor of N that is a multiple of 8 (no pad, no output slice),
         preferring divisors that give an EVEN grid so v7x megacore shards it.
      3) rare fallback for ragged N with no usable divisor: pad the row axis.
    """
    fixed = 2 * (2 * din * dproj * 4) + 2 * 8 * wv * 4        # 2x dbl-buffered weights + vp
    per_row = 2 * 4 * (s + 2 * din + d_out)                   # rs + x1 + x2 + out, dbl-buffered f32
    budget = int(0.6 * _VMEM_LIMIT)
    max_rows = max(8, (budget - fixed) // per_row)
    max_rows = int(min(max_rows, 2048))
    if n <= max_rows:
        return n, n                                           # one full block, grid = 1
    cap = (max_rows // 8) * 8
    divisors = [d for d in range(cap, 7, -8) if n % d == 0]
    if divisors:
        even = [d for d in divisors if (n // d) % 2 == 0]
        if even and even[0] * 2 >= divisors[0]:
            return even[0], n
        return divisors[0], n
    # Ragged N with no clean divisor (e.g. prime): pad rows (costs extra HBM
    # copies of the inputs and an output slice — rare path).
    return cap, _round_up(n, cap)


def _proj_ln(x, w, b, gamma, beta):
    """Linear (encoderN_proj, f32 MXU accumulate) + LayerNorm (f32).

    Variance via E[y^2] - mu^2: two independent reductions off y (shorter
    dependency chain, one fewer full elementwise pass), clamped at 0 before
    rsqrt to guard against cancellation.
    """
    y = jnp.dot(x, w, preferred_element_type=jnp.float32) + b
    mu = jnp.mean(y, axis=-1, keepdims=True)
    ms = jnp.mean(y * y, axis=-1, keepdims=True)
    var = jnp.maximum(ms - mu * mu, 0.0)
    return (y - mu) * jax.lax.rsqrt(var + LN_EPS) * gamma + beta


def _nobs_kernel(rs_ref, x1_ref, x2_ref, w1_ref, w2_ref, vp_ref, out_ref,
                 *, S, Dproj):
    # Packed per-camera vectors (rows): [b1, g1, be1, b2, g2, be2, colscale, 0]
    vp = vp_ref[...]
    b1, g1, be1 = vp[0:1, :Dproj], vp[1:2, :Dproj], vp[2:3, :Dproj]
    b2, g2, be2 = vp[3:4, :Dproj], vp[4:5, :Dproj], vp[5:6, :Dproj]
    colscale = vp[6:7, :S]            # pos/ori mask precomputed on host (all-ones if both on)

    # Direct slice stores: no in-kernel concat temp, no relayout before the store.
    rs = rs_ref[...].astype(jnp.float32) * colscale
    out_ref[:, :S] = rs.astype(out_ref.dtype)
    f1 = _proj_ln(x1_ref[...].astype(jnp.float32), w1_ref[...], b1, g1, be1)
    out_ref[:, S:S + Dproj] = f1.astype(out_ref.dtype)
    f2 = _proj_ln(x2_ref[...].astype(jnp.float32), w2_ref[...], b2, g2, be2)
    out_ref[:, S + Dproj:] = f2.astype(out_ref.dtype)


def actor_training_obs(robot_state, enc1, enc2, params,
                       include_pos=True, include_ori=True,
                       tile_n=None, out_dtype=jnp.float32):
    """Eval-mode Actor._training_obs: fused proj + layernorm + concat + mask + flatten.

    robot_state : (B, T, S)  normalized robot state (S >= 9)
    enc1, enc2  : (N, D_in)  raw vision-encoder outputs, N = B * T
    params      : dict with w1,b1,g1,be1,w2,b2,g2,be2 (weights pre-transposed
                  to (D_in, D_proj), vectors shaped (1, D_proj))
    returns     : (B, T * (S + 2*D_proj))
    """
    B, T, S = robot_state.shape
    assert S >= 9, "pos/ori mask assumes robot_state_dim >= 9"
    N = B * T
    assert enc1.shape[0] == N and enc2.shape[0] == N
    Din = enc1.shape[-1]
    Dproj = params["w1"].shape[1]
    D_out = S + 2 * Dproj

    # All-f32 path (matches the PyTorch module); reshape (B,T,S)->(N,S) is a view.
    rs = robot_state.reshape(N, S)
    if rs.dtype != jnp.float32:
        rs = rs.astype(jnp.float32)
    x1 = enc1 if enc1.dtype == jnp.float32 else enc1.astype(jnp.float32)
    x2 = enc2 if enc2.dtype == jnp.float32 else enc2.astype(jnp.float32)
    w1 = params["w1"].astype(jnp.float32)
    w2 = params["w2"].astype(jnp.float32)

    # Pack bias/gamma/beta for both cameras + the precomputed pos/ori column
    # scale into ONE (8, Wv) tensor (single tiny input stream).
    Wv = max(Dproj, S)

    def padv(v):
        v = v.reshape(1, -1).astype(jnp.float32)
        return jnp.pad(v, ((0, 0), (0, Wv - v.shape[1])))

    col = jnp.arange(Wv)
    colscale = jnp.where(col < 3, jnp.float32(bool(include_pos)),
                         jnp.where(col < 9, jnp.float32(bool(include_ori)),
                                   jnp.float32(1.0))).reshape(1, Wv)
    vp = jnp.concatenate(
        [padv(params["b1"]), padv(params["g1"]), padv(params["be1"]),
         padv(params["b2"]), padv(params["g2"]), padv(params["be2"]),
         colscale, jnp.zeros((1, Wv), jnp.float32)],
        axis=0)                                               # (8, Wv)

    if tile_n is None:
        tile_n, N_pad = _choose_tile_n(N, S, Din, D_out, Dproj, Wv)
    else:
        tile_n = max(8, _round_up(tile_n, 8)) if tile_n < N else N
        N_pad = _round_up(N, tile_n)
    if N_pad != N:
        # Rare fallback (no clean divisor of N): zero-pad rows; LN of a zero row
        # is finite so padded rows are harmless and sliced off below.
        pad = N_pad - N
        rs = jnp.pad(rs, ((0, pad), (0, 0)))
        x1 = jnp.pad(x1, ((0, pad), (0, 0)))
        x2 = jnp.pad(x2, ((0, pad), (0, 0)))
    grid = (N_pad // tile_n,)

    rs_spec = pl.BlockSpec((tile_n, S), lambda i: (i, 0))
    x_spec = pl.BlockSpec((tile_n, Din), lambda i: (i, 0))
    w_spec = pl.BlockSpec((Din, Dproj), lambda i: (0, 0))
    vp_spec = pl.BlockSpec((8, Wv), lambda i: (0, 0))
    out_spec = pl.BlockSpec((tile_n, D_out), lambda i: (i, 0))

    cost = pl.CostEstimate(
        flops=2 * 2 * N_pad * Din * Dproj,
        transcendentals=2 * N_pad,  # one rsqrt per row per camera
        bytes_accessed=(N_pad * S * 4 + 2 * N_pad * Din * 4
                        + 2 * Din * Dproj * 4 + 8 * Wv * 4
                        + N_pad * D_out * jnp.dtype(out_dtype).itemsize),
    )

    kernel = functools.partial(_nobs_kernel, S=S, Dproj=Dproj)

    nobs = pl.pallas_call(
        kernel,
        out_shape=jax.ShapeDtypeStruct((N_pad, D_out), out_dtype),
        grid_spec=pl.GridSpec(
            grid=grid,
            in_specs=[rs_spec, x_spec, x_spec, w_spec, w_spec, vp_spec],
            out_specs=out_spec,
        ),
        compiler_params=pltpu.CompilerParams(
            dimension_semantics=("parallel",),
            vmem_limit_bytes=_VMEM_LIMIT),
        cost_estimate=cost,
    )(rs, x1, x2, w1, w2, vp)

    if N_pad != N:
        nobs = nobs[:N]
    # flatten(start_dim=1): (B*T, D_out) -> (B, T*D_out) is a row-major view reshape.
    return nobs.reshape(B, T * D_out)
    # TODO(synk): vision encoders (encoder1/encoder2), camera transforms and
    # LinearNormalizer are external submodules; their outputs are kernel inputs.
    # TODO(synk): training-only paths (state/feature noise, dropouts, VIB,
    # confusion loss) are skipped — eval-mode forward with default betas = 0.


def actor_training_obs_ref(robot_state, enc1, enc2, params,
                           include_pos=True, include_ori=True):
    """Pure-JAX f32 reference (standard LayerNorm form) for validation."""
    B, T, S = robot_state.shape

    def proj_ln(x, w, b, g, be):
        y = jnp.dot(x.astype(jnp.float32), w.astype(jnp.float32),
                    preferred_element_type=jnp.float32) + b
        mu = jnp.mean(y, -1, keepdims=True)
        var = jnp.mean((y - mu) ** 2, -1, keepdims=True)
        return (y - mu) * jax.lax.rsqrt(var + LN_EPS) * g + be

    f1 = proj_ln(enc1, params["w1"], params["b1"], params["g1"],
                 params["be1"]).reshape(B, T, -1)
    f2 = proj_ln(enc2, params["w2"], params["b2"], params["g2"],
                 params["be2"]).reshape(B, T, -1)
    nobs = jnp.concatenate([robot_state.astype(jnp.float32), f1, f2], axis=-1)
    scale = jnp.ones((nobs.shape[-1],), jnp.float32)
    scale = scale.at[:3].set(float(include_pos)).at[3:9].set(float(include_ori))
    nobs = nobs * scale
    return nobs.reshape(B, T * nobs.shape[-1])


if __name__ == "__main__":
    key = jax.random.PRNGKey(0)
    ks = jax.random.split(key, 12)

    # Small shapes consistent with the module (B envs, obs_horizon T,
    # robot_state_dim S, encoder output Din, actor_cfg.projection_dim Dproj).
    B, T = 16, 2
    S = 16
    Din = 128
    Dproj = 64
    N = B * T

    robot_state = jax.random.normal(ks[0], (B, T, S), jnp.float32)
    enc1 = jax.random.normal(ks[1], (N, Din), jnp.float32)
    enc2 = jax.random.normal(ks[2], (N, Din), jnp.float32)

    # Deterministic parameter init (torch Linear weight is (out, in) -> pass W.T).
    w1_t = jax.random.normal(ks[3], (Dproj, Din), jnp.float32) * 0.05
    w2_t = jax.random.normal(ks[4], (Dproj, Din), jnp.float32) * 0.05
    params = {
        "w1": w1_t.T,                                                 # (Din, Dproj)
        "b1": jax.random.normal(ks[5], (1, Dproj), jnp.float32) * 0.05,
        "g1": 1.0 + 0.1 * jax.random.normal(ks[6], (1, Dproj), jnp.float32),
        "be1": 0.1 * jax.random.normal(ks[7], (1, Dproj), jnp.float32),
        "w2": w2_t.T,
        "b2": jax.random.normal(ks[8], (1, Dproj), jnp.float32) * 0.05,
        "g2": 1.0 + 0.1 * jax.random.normal(ks[9], (1, Dproj), jnp.float32),
        "be2": 0.1 * jax.random.normal(ks[10], (1, Dproj), jnp.float32),
    }

    # Default path (both proprioceptive masks on): small N -> single full tile, grid=1.
    nobs = actor_training_obs(robot_state, enc1, enc2, params)
    nobs = jax.block_until_ready(nobs)
    assert nobs.shape == (B, T * (S + 2 * Dproj)), nobs.shape
    assert bool(jnp.all(jnp.isfinite(nobs)))
    ref = actor_training_obs_ref(robot_state, enc1, enc2, params)
    err = float(jnp.max(jnp.abs(nobs - ref)))
    assert err < 2e-2, f"mismatch vs reference: {err}"

    # Masked path (exercises the precomputed pos/ori column-scale row).
    nobs_m = actor_training_obs(robot_state, enc1, enc2, params,
                                include_pos=False, include_ori=True)
    nobs_m = jax.block_until_ready(nobs_m)
    ref_m = actor_training_obs_ref(robot_state, enc1, enc2, params,
                                   include_pos=False, include_ori=True)
    err_m = float(jnp.max(jnp.abs(nobs_m - ref_m)))
    assert err_m < 2e-2, f"masked-path mismatch vs reference: {err_m}"

    # Multi-tile path (forces grid > 1, exercises the divisor-based tiling).
    nobs_t = actor_training_obs(robot_state, enc1, enc2, params, tile_n=16)
    nobs_t = jax.block_until_ready(nobs_t)
    err_t = float(jnp.max(jnp.abs(nobs_t - ref)))
    assert err_t < 2e-2, f"tiled-path mismatch vs reference: {err_t}"

    print("KERNEL_OK")
</pallas_src>

<mosaic_0001>
module attributes {stable_mosaic.version = 11 : i64} {
  func.func @_nobs_kernel(%arg0: i32, %arg1: memref<32x16xf32, #tpu.memory_space<vmem>>, %arg2: memref<32x128xf32, #tpu.memory_space<vmem>>, %arg3: memref<32x128xf32, #tpu.memory_space<vmem>>, %arg4: memref<128x64xf32, #tpu.memory_space<vmem>>, %arg5: memref<128x64xf32, #tpu.memory_space<vmem>>, %arg6: memref<8x64xf32, #tpu.memory_space<vmem>>, %arg7: memref<32x144xf32, #tpu.memory_space<vmem>>) attributes {dimension_semantics = [#tpu.dimension_semantics<parallel>], iteration_bounds = array<i64: 1>, scalar_prefetch = 0 : i64, scratch_operands = 0 : i64, tpu.core_type = #tpu.core_type<tc>, window_params = [{transform_indices = @transform_0, window_bounds = array<i64: 32, 16>}, {transform_indices = @transform_1, window_bounds = array<i64: 32, 128>}, {transform_indices = @transform_2, window_bounds = array<i64: 32, 128>}, {pipeline_mode = #tpu.pipeline_mode<synchronous>, transform_indices = @transform_3, window_bounds = array<i64: 128, 64>}, {pipeline_mode = #tpu.pipeline_mode<synchronous>, transform_indices = @transform_4, window_bounds = array<i64: 128, 64>}, {pipeline_mode = #tpu.pipeline_mode<synchronous>, transform_indices = @transform_5, window_bounds = array<i64: 8, 64>}, {transform_indices = @transform_6, window_bounds = array<i64: 32, 144>}]} {
    %c0 = arith.constant 0 : index
    %c0_0 = arith.constant 0 : index
    %0 = vector.load %arg6[%c0, %c0_0] : memref<8x64xf32, #tpu.memory_space<vmem>>, vector<8x64xf32>
    %1 = vector.extract_strided_slice %0 {offsets = [0, 0], sizes = [1, 64], strides = [1, 1]} : vector<8x64xf32> to vector<1x64xf32>
    %2 = vector.extract_strided_slice %0 {offsets = [1, 0], sizes = [1, 64], strides = [1, 1]} : vector<8x64xf32> to vector<1x64xf32>
    %3 = vector.extract_strided_slice %0 {offsets = [2, 0], sizes = [1, 64], strides = [1, 1]} : vector<8x64xf32> to vector<1x64xf32>
    %4 = vector.extract_strided_slice %0 {offsets = [3, 0], sizes = [1, 64], strides = [1, 1]} : vector<8x64xf32> to vector<1x64xf32>
    %5 = vector.extract_strided_slice %0 {offsets = [4, 0], sizes = [1, 64], strides = [1, 1]} : vector<8x64xf32> to vector<1x64xf32>
    %6 = vector.extract_strided_slice %0 {offsets = [5, 0], sizes = [1, 64], strides = [1, 1]} : vector<8x64xf32> to vector<1x64xf32>
    %7 = vector.extract_strided_slice %0 {offsets = [6, 0], sizes = [1, 16], strides = [1, 1]} : vector<8x64xf32> to vector<1x16xf32>
    %c0_1 = arith.constant 0 : index
    %c0_2 = arith.constant 0 : index
    %8 = vector.load %arg1[%c0_1, %c0_2] : memref<32x16xf32, #tpu.memory_space<vmem>>, vector<32x16xf32>
    %9 = vector.broadcast %7 : vector<1x16xf32> to vector<32x16xf32>
    %10 = arith.mulf %8, %9 : vector<32x16xf32>
    %c0_3 = arith.constant 0 : index
    %c0_4 = arith.constant 0 : index
    %11 = vector.load %arg7[%c0_3, %c0_4] : memref<32x144xf32, #tpu.memory_space<vmem>>, vector<32x16xf32>
    tpu.vector_store %arg7[%c0_3, %c0_4], %10 {strides = array<i32>} : memref<32x144xf32, #tpu.memory_space<vmem>>, vector<32x16xf32>,
    %c0_5 = arith.constant 0 : index
    %c0_6 = arith.constant 0 : index
    %12 = vector.load %arg2[%c0_5, %c0_6] : memref<32x128xf32, #tpu.memory_space<vmem>>, vector<32x128xf32>
    %c0_7 = arith.constant 0 : index
    %c0_8 = arith.constant 0 : index
    %13 = vector.load %arg4[%c0_7, %c0_8] : memref<128x64xf32, #tpu.memory_space<vmem>>, vector<128x64xf32>
    %cst = arith.constant dense<0.000000e+00> : vector<32x64xf32>
    %14 = tpu.matmul %12, %13, %cst {dimension_numbers = #tpu.dot_dimension_numbers<[1], [0], [0], [1], [0, 0, 1, 1], [], []>} : vector<32x128xf32>, vector<128x64xf32>, vector<32x64xf32> -> vector<32x64xf32>
    %15 = vector.broadcast %1 : vector<1x64xf32> to vector<32x64xf32>
    %16 = arith.addf %14, %15 : vector<32x64xf32>
    %cst_9 = arith.constant dense<0.000000e+00> : vector<32xf32>
    %17 = vector.multi_reduction <add>, %16, %cst_9 [1] : vector<32x64xf32> to vector<32xf32>
    %18 = vector.shape_cast %17 : vector<32xf32> to vector<32x1xf32>
    %cst_10 = arith.constant 6.400000e+01 : f32
    %19 = vector.broadcast %cst_10 : f32 to vector<32x1xf32>
    %20 = arith.divf %18, %19 : vector<32x1xf32>
    %21 = arith.mulf %16, %16 : vector<32x64xf32>
    %cst_11 = arith.constant dense<0.000000e+00> : vector<32xf32>
    %22 = vector.multi_reduction <add>, %21, %cst_11 [1] : vector<32x64xf32> to vector<32xf32>
    %23 = vector.shape_cast %22 : vector<32xf32> to vector<32x1xf32>
    %cst_12 = arith.constant 6.400000e+01 : f32
    %24 = vector.broadcast %cst_12 : f32 to vector<32x1xf32>
    %25 = arith.divf %23, %24 : vector<32x1xf32>
    %26 = arith.mulf %20, %20 : vector<32x1xf32>
    %27 = arith.subf %25, %26 : vector<32x1xf32>
    %cst_13 = arith.constant 0.000000e+00 : f32
    %28 = vector.broadcast %cst_13 : f32 to vector<32x1xf32>
    %29 = arith.maximumf %27, %28 : vector<32x1xf32>
    %30 = vector.broadcast %20 : vector<32x1xf32> to vector<32x64xf32>
    %31 = arith.subf %16, %30 : vector<32x64xf32>
    %cst_14 = arith.constant 9.99999974E-6 : f32
    %32 = vector.broadcast %cst_14 : f32 to vector<32x1xf32>
    %33 = arith.addf %29, %32 : vector<32x1xf32>
    %34 = math.rsqrt %33 : vector<32x1xf32>
    %35 = vector.broadcast %34 : vector<32x1xf32> to vector<32x64xf32>
    %36 = arith.mulf %31, %35 : vector<32x64xf32>
    %37 = vector.broadcast %2 : vector<1x64xf32> to vector<32x64xf32>
    %38 = arith.mulf %36, %37 : vector<32x64xf32>
    %39 = vector.broadcast %3 : vector<1x64xf32> to vector<32x64xf32>
    %40 = arith.addf %38, %39 : vector<32x64xf32>
    %c0_15 = arith.constant 0 : index
    %c16 = arith.constant 16 : index
    %41 = vector.load %arg7[%c0_15, %c16] : memref<32x144xf32, #tpu.memory_space<vmem>>, vector<32x64xf32>
    tpu.vector_store %arg7[%c0_15, %c16], %40 {strides = array<i32>} : memref<32x144xf32, #tpu.memory_space<vmem>>, vector<32x64xf32>,
    %c0_16 = arith.constant 0 : index
    %c0_17 = arith.constant 0 : index
    %42 = vector.load %arg3[%c0_16, %c0_17] : memref<32x128xf32, #tpu.memory_space<vmem>>, vector<32x128xf32>
    %c0_18 = arith.constant 0 : index
    %c0_19 = arith.constant 0 : index
    %43 = vector.load %arg5[%c0_18, %c0_19] : memref<128x64xf32, #tpu.memory_space<vmem>>, vector<128x64xf32>
    %cst_20 = arith.constant dense<0.000000e+00> : vector<32x64xf32>
    %44 = tpu.matmul %42, %43, %cst_20 {dimension_numbers = #tpu.dot_dimension_numbers<[1], [0], [0], [1], [0, 0, 1, 1], [], []>} : vector<32x128xf32>, vector<128x64xf32>, vector<32x64xf32> -> vector<32x64xf32>
    %45 = vector.broadcast %4 : vector<1x64xf32> to vector<32x64xf32>
    %46 = arith.addf %44, %45 : vector<32x64xf32>
    %cst_21 = arith.constant dense<0.000000e+00> : vector<32xf32>
    %47 = vector.multi_reduction <add>, %46, %cst_21 [1] : vector<32x64xf32> to vector<32xf32>
    %48 = vector.shape_cast %47 : vector<32xf32> to vector<32x1xf32>
    %cst_22 = arith.constant 6.400000e+01 : f32
    %49 = vector.broadcast %cst_22 : f32 to vector<32x1xf32>
    %50 = arith.divf %48, %49 : vector<32x1xf32>
    %51 = arith.mulf %46, %46 : vector<32x64xf32>
    %cst_23 = arith.constant dense<0.000000e+00> : vector<32xf32>
    %52 = vector.multi_reduction <add>, %51, %cst_23 [1] : vector<32x64xf32> to vector<32xf32>
    %53 = vector.shape_cast %52 : vector<32xf32> to vector<32x1xf32>
    %cst_24 = arith.constant 6.400000e+01 : f32
    %54 = vector.broadcast %cst_24 : f32 to vector<32x1xf32>
    %55 = arith.divf %53, %54 : vector<32x1xf32>
    %56 = arith.mulf %50, %50 : vector<32x1xf32>
    %57 = arith.subf %55, %56 : vector<32x1xf32>
    %cst_25 = arith.constant 0.000000e+00 : f32
    %58 = vector.broadcast %cst_25 : f32 to vector<32x1xf32>
    %59 = arith.maximumf %57, %58 : vector<32x1xf32>
    %60 = vector.broadcast %50 : vector<32x1xf32> to vector<32x64xf32>
    %61 = arith.subf %46, %60 : vector<32x64xf32>
    %cst_26 = arith.constant 9.99999974E-6 : f32
    %62 = vector.broadcast %cst_26 : f32 to vector<32x1xf32>
    %63 = arith.addf %59, %62 : vector<32x1xf32>
    %64 = math.rsqrt %63 : vector<32x1xf32>
    %65 = vector.broadcast %64 : vector<32x1xf32> to vector<32x64xf32>
    %66 = arith.mulf %61, %65 : vector<32x64xf32>
    %67 = vector.broadcast %5 : vector<1x64xf32> to vector<32x64xf32>
    %68 = arith.mulf %66, %67 : vector<32x64xf32>
    %69 = vector.broadcast %6 : vector<1x64xf32> to vector<32x64xf32>
    %70 = arith.addf %68, %69 : vector<32x64xf32>
    %c0_27 = arith.constant 0 : index
    %c80 = arith.constant 80 : index
    %71 = vector.load %arg7[%c0_27, %c80] : memref<32x144xf32, #tpu.memory_space<vmem>>, vector<32x64xf32>
    tpu.vector_store %arg7[%c0_27, %c80], %70 {strides = array<i32>} : memref<32x144xf32, #tpu.memory_space<vmem>>, vector<32x64xf32>,
    return
  }
  func.func @transform_0(%arg0: i32) -> (i32, i32) {
    %c0_i32 = arith.constant 0 : i32
    %c0_i32_0 = arith.constant 0 : i32
    return %arg0, %c0_i32 : i32, i32
  }
  func.func @transform_1(%arg0: i32) -> (i32, i32) {
    %c0_i32 = arith.constant 0 : i32
    %c0_i32_0 = arith.constant 0 : i32
    return %arg0, %c0_i32 : i32, i32
  }
  func.func @transform_2(%arg0: i32) -> (i32, i32) {
    %c0_i32 = arith.constant 0 : i32
    %c0_i32_0 = arith.constant 0 : i32
    return %arg0, %c0_i32 : i32, i32
  }
  func.func @transform_3(%arg0: i32) -> (i32, i32) {
    %c0_i32 = arith.constant 0 : i32
    %c0_i32_0 = arith.constant 0 : i32
    %c0_i32_1 = arith.constant 0 : i32
    return %c0_i32, %c0_i32_0 : i32, i32
  }
  func.func @transform_4(%arg0: i32) -> (i32, i32) {
    %c0_i32 = arith.constant 0 : i32
    %c0_i32_0 = arith.constant 0 : i32
    %c0_i32_1 = arith.constant 0 : i32
    return %c0_i32, %c0_i32_0 : i32, i32
  }
  func.func @transform_5(%arg0: i32) -> (i32, i32) {
    %c0_i32 = arith.constant 0 : i32
    %c0_i32_0 = arith.constant 0 : i32
    %c0_i32_1 = arith.constant 0 : i32
    return %c0_i32, %c0_i32_0 : i32, i32
  }
  func.func @transform_6(%arg0: i32) -> (i32, i32) {
    %c0_i32 = arith.constant 0 : i32
    %c0_i32_0 = arith.constant 0 : i32
    return %arg0, %c0_i32 : i32, i32
  }
}

</mosaic_0001>

<bundles_post_ra>
// kernel: tpu_custom_call.1
= control target key start
LH: loop header
LB: loop body
LE: loop exit
PB: predicated region body
PF: predicated region fallthrough
CT: control target
= control target key end

     0   :  { %s984_s0 = inlined_call_operand.vmem [shape: f32[32,16], index: 0, kind: input, shape index: {}]   ;;  %s985_s1 = inlined_call_operand.vmem [shape: f32[32,128], index: 1, kind: input, shape index: {}]   ;;  %s986_s2 = inlined_call_operand.vmem [shape: f32[32,128], index: 2, kind: input, shape index: {}]   ;;  %s987_s3 = inlined_call_operand.vmem [shape: f32[128,64], index: 3, kind: input, shape index: {}]   ;;  %s988_s4 = inlined_call_operand.vmem [shape: f32[128,64], index: 4, kind: input, shape index: {}]   ;;  %s989_s5 = inlined_call_operand.vmem [shape: f32[8,64], index: 5, kind: input, shape index: {}]   ;;  %s990_s6 = inlined_call_operand.hbm [shape: f32[32,144], index: 6, kind: output, shape index: {}]  }
   0x1   :  { %v61_v0 = vld [vmem:[%s987_s3 + $0x78] sm:$0xff]  ;;  %v60_v2 = vld [vmem:[%s987_s3 + $0x70] sm:$0xff]  ;;  %v59_v4 = vld [vmem:[%s987_s3 + $0x68] sm:$0xff] }
   0x2   :  { %v273_v1 = vld [vmem:[%s988_s4 + $0x78] sm:$0xff]  ;;  %524 = vmatprep.subr.mxu0 %v61_v0  ;;  %v272_v3 = vld [vmem:[%s988_s4 + $0x70] sm:$0xff]  ;;  %v271_v5 = vld [vmem:[%s988_s4 + $0x68] sm:$0xff] }
   0x3   :  { %562 = vmatprep.subr.mxu1 %v273_v1  ;;  %525 = vmatpush3.msra.mxu0 %v61_v0  ;;  %v58_v6 = vld [vmem:[%s987_s3 + $0x60] sm:$0xff]  ;;  %v57_v8 = vld [vmem:[%s987_s3 + $0x58] sm:$0xff]  ;;  %v56_v10 = vld [vmem:[%s987_s3 + $0x50] sm:$0xff] }
   0x4   :  { %563 = vmatpush3.msra.mxu1 %v273_v1  ;;  %526 = vmatprep.subr.mxu0 %v60_v2  ;;  %v270_v7 = vld [vmem:[%s988_s4 + $0x60] sm:$0xff]  ;;  %v269_v9 = vld [vmem:[%s988_s4 + $0x58] sm:$0xff]  ;;  %v268_v11 = vld [vmem:[%s988_s4 + $0x50] sm:$0xff] }
   0x5   :  { %564 = vmatprep.subr.mxu1 %v272_v3  ;;  %527 = vmatpush3.msra.mxu0 %v60_v2  ;;  %v55_v12 = vld [vmem:[%s987_s3 + $0x48] sm:$0xff]  ;;  %v54_v14 = vld [vmem:[%s987_s3 + $0x40] sm:$0xff] }
   0x6   :  { %565 = vmatpush3.msra.mxu1 %v272_v3  ;;  %528 = vmatprep.subr.mxu0 %v59_v4  ;;  %v267_v13 = vld [vmem:[%s988_s4 + $0x48] sm:$0xff]  ;;  %v266_v15 = vld [vmem:[%s988_s4 + $0x40] sm:$0xff] }
   0x7   :  { %566 = vmatprep.subr.mxu1 %v271_v5  ;;  %529 = vmatpush3.msra.mxu0 %v59_v4 }
   0x8   :  { %567 = vmatpush3.msra.mxu1 %v271_v5  ;;  %530 = vmatprep.subr.mxu0 %v58_v6 }
   0x9   :  { %568 = vmatprep.subr.mxu1 %v270_v7  ;;  %531 = vmatpush3.msra.mxu0 %v58_v6 }
   0xa   :  { %569 = vmatpush3.msra.mxu1 %v270_v7  ;;  %532 = vmatprep.subr.mxu0 %v57_v8 }
   0xb   :  { %570 = vmatprep.subr.mxu1 %v269_v9  ;;  %533 = vmatpush3.msra.mxu0 %v57_v8 }
   0xc   :  { %571 = vmatpush3.msra.mxu1 %v269_v9  ;;  %534 = vmatprep.subr.mxu0 %v56_v10 }
   0xd   :  { %572 = vmatprep.subr.mxu1 %v268_v11  ;;  %535 = vmatpush3.msra.mxu0 %v56_v10 }
   0xe   :  { %573 = vmatpush3.msra.mxu1 %v268_v11  ;;  %536 = vmatprep.subr.mxu0 %v55_v12 }
   0xf   :  { %574 = vmatprep.subr.mxu1 %v267_v13 }
  0x10   :  { %11 = vsyncpa [#allocation3], 0  ;;  %537 = vmatpush3.msra.mxu0 %v55_v12  ;;  %575 = vmatpush3.msra.mxu1 %v267_v13  ;;  %v53_v16 = vld [vmem:[%s987_s3 + $0x38] sm:$0xff]  ;;  %v52_v18 = vld [vmem:[%s987_s3 + $0x30] sm:$0xff]  ;;  %v29_v40 = vlaneseq  ;;  %vm151_vm0 = vcmask 523264   ;;  %vm37_vm1 = vcmask 130048  }
  0x11   :  { %v265_v17 = vld [vmem:[%s988_s4 + $0x38] sm:$0xff]  ;;  %538 = vmatprep.subr.mxu0 %v54_v14  ;;  %576 = vmatprep.subr.mxu1 %v266_v15  ;;  %v264_v19 = vld [vmem:[%s988_s4 + $0x30] sm:$0xff]  ;;  %v51_v20 = vld [vmem:[%s987_s3 + $0x28] sm:$0xff]  ;;  %s642_s30 = smov 16   ;;  %s643_s9 = smov 80   ;;  %vm249_vm2 = vcmask 654464  }
  0x12   :  { %539 = vmatpush3.msra.mxu0 %v54_v14  ;;  %577 = vmatpush3.msra.mxu1 %v266_v15  ;;  %v263_v21 = vld [vmem:[%s988_s4 + $0x28] sm:$0xff]  ;;  %v50_v22 = vld [vmem:[%s987_s3 + $0x20] sm:$0xff]  ;;  %v49_v24 = vld [vmem:[%s987_s3 + $0x18] sm:$0xff]  ;;  %v801_v41 = vshrl.u32 %v29_v40, 7  ;;  %vm459_vm3 = vcmask 1048192  }
  0x13   :  { %540 = vmatprep.subr.mxu0 %v53_v16  ;;  %578 = vmatprep.subr.mxu1 %v265_v17  ;;  %v262_v23 = vld [vmem:[%s988_s4 + $0x20] sm:$0xff]  ;;  %v261_v25 = vld [vmem:[%s988_s4 + $0x18] sm:$0xff]  ;;  %v48_v26 = vld [vmem:[%s987_s3 + $0x10] sm:$0xff] }
  0x14   :  { %541 = vmatpush3.msra.mxu0 %v53_v16  ;;  %579 = vmatpush3.msra.mxu1 %v265_v17  ;;  %v260_v27 = vld [vmem:[%s988_s4 + $0x10] sm:$0xff]  ;;  %v47_v28 = vld [vmem:[%s987_s3 + $0x8] sm:$0xff]  ;;  %v46_v30 = vld [vmem:[%s987_s3] sm:$0xff]  ;;  %v64_v42 = vsub.s32 0, %v801_v41  ;;  %v276_v43 = vsub.s32 3, %v801_v41 }
  0x15   :  { %542 = vmatprep.subr.mxu0 %v52_v18  ;;  %580 = vmatprep.subr.mxu1 %v264_v19  ;;  %v259_v29 = vld [vmem:[%s988_s4 + $0x8] sm:$0xff]  ;;  %v258_v31 = vld [vmem:[%s988_s4] sm:$0xff]  ;;  %v44_v36 = vld [vmem:[%s985_s1 + $0x10] sm:$0xff] }
  0x16   :  { %543 = vmatpush3.msra.mxu0 %v52_v18  ;;  %581 = vmatpush3.msra.mxu1 %v264_v19  ;;  %v42_v32 = vld [vmem:[%s985_s1] sm:$0xff]  ;;  %v43_v34 = vld [vmem:[%s985_s1 + $0x8] sm:$0xff]  ;;  %v256_v37 = vld [vmem:[%s986_s2 + $0x10] sm:$0xff] }
  0x17   :  { %544 = vmatprep.subr.mxu0 %v51_v20  ;;  %582 = vmatprep.subr.mxu1 %v263_v21  ;;  %v254_v33 = vld [vmem:[%s986_s2] sm:$0xff]  ;;  %v255_v35 = vld [vmem:[%s986_s2 + $0x8] sm:$0xff]  ;;  %v45_v38 = vld [vmem:[%s985_s1 + $0x18] sm:$0xff] }
  0x18   :  { %545 = vmatpush3.msra.mxu0 %v51_v20  ;;  %583 = vmatpush3.msra.mxu1 %v263_v21  ;;  %v257_v39 = vld [vmem:[%s986_s2 + $0x18] sm:$0xff]  ;;  %v808_v44 = vld [vmem:[%s989_s5] sm:$0xff] }
  0x19   :  { %546 = vmatprep.subr.mxu0 %v50_v22  ;;  %584 = vmatprep.subr.mxu1 %v262_v23  ;;  %v65_v45 = vrot.slane %v808_v44, %v64_v42  ;;  %v277_v46 = vrot.slane %v808_v44, %v276_v43 }
  0x1a   :  { %547 = vmatpush3.msra.mxu0 %v50_v22  ;;  %585 = vmatpush3.msra.mxu1 %v262_v23 }
  0x1b   :  { %548 = vmatprep.subr.mxu0 %v49_v24  ;;  %586 = vmatprep.subr.mxu1 %v261_v25 }
  0x1c   :  { %549 = vmatpush3.msra.mxu0 %v49_v24  ;;  %587 = vmatpush3.msra.mxu1 %v261_v25 }
  0x1d   :  { %550 = vmatprep.subr.mxu0 %v48_v26  ;;  %588 = vmatprep.subr.mxu1 %v260_v27 }
  0x1e   :  { %551 = vmatpush3.msra.mxu0 %v48_v26  ;;  %589 = vmatpush3.msra.mxu1 %v260_v27 }
  0x1f   :  { %552 = vmatprep.subr.mxu0 %v47_v28  ;;  %590 = vmatprep.subr.mxu1 %v259_v29 }
  0x20   :  { %553 = vmatpush3.msra.mxu0 %v47_v28  ;;  %591 = vmatpush3.msra.mxu1 %v259_v29 }
  0x21   :  { %554 = vmatprep.subr.mxu0 %v46_v30  ;;  %592 = vmatprep.subr.mxu1 %v258_v31 }
  0x22   :  { %555 = vmatpush3.msra.mxu0 %v46_v30  ;;  %556 = vmatprep.mubr.f32.mxu0 %v42_v32 }
  0x23   :  { %593 = vmatpush3.msra.mxu1 %v258_v31  ;;  %594 = vmatprep.mubr.f32.mxu1 %v254_v33 }
  0x24   :  { %557 = vmatmul.mubr.f32.vlgmr.msra.gmra.mxu0 %v43_v34  ;;  %595 = vmatmul.mubr.f32.vlgmr.msra.gmra.mxu1 %v255_v35 }
  0x25   :  { %559 = vmatprep.mubr.f32.mxu0 %v44_v36  ;;  %597 = vmatprep.mubr.f32.mxu1 %v256_v37 }
  0x28   :  { %560 = vmatmul.mubr.f32.gmra.mxu0 %v45_v38  ;;  %598 = vmatmul.mubr.f32.gmra.mxu1 %v257_v39 }
  0xe4   :  { %v558_v47 = vpop.f32.mrf.mxu0  ;;  %v596_v48 = vpop.f32.mrf.mxu1 }
  0xe5   :  { %v812_v49 = vadd.f32 %v558_v47, %v65_v45  ;;  %v814_v50 = vadd.f32 %v596_v48, %v277_v46 }
  0xe6   :  { %v132_v51 = vpop.f32.mrf.mxu0  ;;  %v344_v55 = vpop.f32.mrf.mxu1 }
  0xe7   :  { %v816_v52 = vadd.f32 %v132_v51, %v65_v45  ;;  %v366_v53 = vsel %vm151_vm0, %v814_v50, 0.0  ;;  %v155_v54 = vsel %vm151_vm0, %v812_v49, 0.0  ;;  %v170_v56 = vmul.f32 %v812_v49, %v812_v49 }
  0xe8   :  { %367 = vadd.xlane.f32.xlu1 %v366_v53  ;;  %156 = vadd.xlane.f32.xlu0 %v155_v54  ;;  %v825_v58 = vadd.f32 %v344_v55, %v277_v46  ;;  %v380_v60 = vmul.f32 %v814_v50, %v814_v50  ;;  %v561_v61 = vpop.f32.mrf.mxu0  ;;  %v599_v2 = vpop.f32.mrf.mxu1  ;;  %v26_v54 = vld [vmem:[%s984_s0 + $0x8] sm:$0xff] }
  0xe9   :  { %v176_v57 = vsel %vm151_vm0, %v170_v56, 0.0  ;;  %v152_v59 = vsel %vm151_vm0, %v816_v52, 0.0  ;;  %v831_v62 = vadd.f32 %v561_v61, %v65_v45  ;;  %v169_v1 = vmul.f32 %v816_v52, %v816_v52 }
  0xea   :  { %v386_v63 = vsel %vm151_vm0, %v380_v60, 0.0  ;;  %v363_v0 = vsel %vm151_vm0, %v825_v58, 0.0  ;;  %v838_v3 = vadd.f32 %v599_v2, %v277_v46  ;;  %v379_v6 = vmul.f32 %v825_v58, %v825_v58  ;;  %v142_v7 = vpop.f32.mrf.mxu0  ;;  %v354_v8 = vpop.f32.mrf.mxu1 }
  0xeb   :  { %v161_v4 = vsel %vm151_vm0, %v831_v62, 0.0  ;;  %v173_v5 = vsel %vm151_vm0, %v169_v1, 0.0  ;;  %v847_v10 = vadd.f32 %v142_v7, %v65_v45  ;;  %v849_v11 = vadd.f32 %v354_v8, %v277_v46 }
  0xec   :  { %177 = vadd.xlane.f32.xlu1 %v176_v57  ;;  %153 = vadd.xlane.f32.xlu0 %v152_v59  ;;  %v372_v9 = vsel %vm151_vm0, %v838_v3, 0.0  ;;  %v383_v12 = vsel %vm151_vm0, %v379_v6, 0.0  ;;  %v172_v15 = vmul.f32 %v831_v62, %v831_v62  ;;  %v382_v19 = vmul.f32 %v838_v3, %v838_v3 }
  0xed   :  { %v158_v13 = vsel %vm151_vm0, %v847_v10, 0.0  ;;  %v369_v14 = vsel %vm151_vm0, %v849_v11, 0.0  ;;  %v171_v16 = vmul.f32 %v847_v10, %v847_v10  ;;  %v381_v20 = vmul.f32 %v849_v11, %v849_v11 }
  0xee   :  { %v182_v17 = vsel %vm151_vm0, %v172_v15, 0.0  ;;  %v392_v21 = vsel %vm151_vm0, %v382_v19, 0.0  ;;  %v31_v45 = vsub.s32 6, %v801_v41  ;;  %v219_v8 = vsub.s32 1, %v801_v41 }
  0xef   :  { %v179_v18 = vsel %vm151_vm0, %v171_v16, 0.0  ;;  %v389_v22 = vsel %vm151_vm0, %v381_v20, 0.0 }
  0xf0   :  { %387 = vadd.xlane.f32.xlu1 %v386_v63  ;;  %364 = vadd.xlane.f32.xlu0 %v363_v0  ;;  %v887_v57 = vrot.slane %v808_v44, %v31_v45 }
  0xf2   :  { %v34_v63 = vmul.f32 %v887_v57, %v26_v54 }
  0xf4   :  { %162 = vadd.xlane.f32.xlu1 %v161_v4  ;;  %174 = vadd.xlane.f32.xlu0 %v173_v5  ;;  %39 = vst.msk [vmem:[#allocation2 + $0x10] sm:$0xff] %vm37_vm1, %v34_v63 }
  0xf8   :  { %373 = vadd.xlane.f32.xlu1 %v372_v9  ;;  %384 = vadd.xlane.f32.xlu0 %v383_v12  ;;  %v227_v12 = vsub.s32 2, %v801_v41 }
  0xfc   :  { %159 = vadd.xlane.f32.xlu1 %v158_v13  ;;  %370 = vadd.xlane.f32.xlu0 %v369_v14 }
 0x100   :  { %183 = vadd.xlane.f32.xlu1 %v182_v17  ;;  %180 = vadd.xlane.f32.xlu0 %v179_v18 }
 0x104   :  { %393 = vadd.xlane.f32.xlu1 %v392_v21  ;;  %390 = vadd.xlane.f32.xlu0 %v389_v22  ;;  %v25_v22 = vld [vmem:[%s984_s0] sm:$0xff] }
 0x171   :  { %v368_v23 = vpop.xlane.xlu1 %367  ;;  %v157_v24 = vpop.xlane.xlu0 %156 }
 0x172   :  { %v868_v25 = vmul.f32 0.015625, %v157_v24  ;;  %v872_v29 = vmul.f32 0.015625, %v368_v23  ;;  %v913_v23 = vrot.slane %v808_v44, %v219_v8  ;;  %v429_v24 = vsub.s32 4, %v801_v41 }
 0x174   :  { %v190_v26 = vmul.f32 %v868_v25, %v868_v25  ;;  %v400_v35 = vmul.f32 %v872_v29, %v872_v29  ;;  %v202_v13 = vsub.f32 %v812_v49, %v868_v25  ;;  %v33_v25 = vmul.f32 %v887_v57, %v25_v22 }
 0x175   :  { %v178_v27 = vpop.xlane.xlu1 %177  ;;  %v154_v28 = vpop.xlane.xlu0 %153 }
 0x176   :  { %v186_v30 = vmul.f32 0.015625, %v178_v27  ;;  %v874_v32 = vmul.f32 0.015625, %v154_v28  ;;  %38 = vst.msk [vmem:[#allocation2] sm:$0xff] %vm37_vm1, %v33_v25 }
 0x178   :  { %v194_v31 = vsub.f32 %v186_v30, %v190_v26  ;;  %v189_v40 = vmul.f32 %v874_v32, %v874_v32 }
 0x179   :  { %v388_v33 = vpop.xlane.xlu1 %387  ;;  %v365_v34 = vpop.xlane.xlu0 %364 }
 0x17a   :  { %v198_v36 = vmax.f32 %v194_v31, 0.0  ;;  %v396_v37 = vmul.f32 0.015625, %v388_v33  ;;  %v881_v47 = vmul.f32 0.015625, %v365_v34 }
 0x17c   :  { %v206_v38 = vadd.f32 1e-05, %v198_v36  ;;  %v404_v39 = vsub.f32 %v396_v37, %v400_v35  ;;  %v399_v59 = vmul.f32 %v881_v47, %v881_v47  ;;  %v922_v35 = vrot.slane %v808_v44, %v227_v12  ;;  %v27_v12 = vld [vmem:[%s984_s0 + $0x10] sm:$0xff] }
 0x17d   :  { %v163_v42 = vpop.xlane.xlu1 %162  ;;  %v175_v43 = vpop.xlane.xlu0 %174  ;;  %v437_v36 = vsub.s32 5, %v801_v41 }
 0x17e   :  { %604 = vrsqrt.f32 %v206_v38  ;;  %v408_v46 = vmax.f32 %v404_v39, 0.0  ;;  %v185_v48 = vmul.f32 0.015625, %v175_v43  ;;  %v892_v2 = vmul.f32 0.015625, %v163_v42 }
 0x17f   :  { %v412_v43 = vsub.f32 %v814_v50, %v872_v29 }
 0x180   :  { %v416_v51 = vadd.f32 1e-05, %v408_v46  ;;  %v193_v53 = vsub.f32 %v185_v48, %v189_v40  ;;  %v192_v14 = vmul.f32 %v892_v2, %v892_v2  ;;  %v430_v46 = vrot.slane %v808_v44, %v429_v24 }
 0x181   :  { %v374_v55 = vpop.xlane.xlu1 %373  ;;  %v385_v56 = vpop.xlane.xlu0 %384 }
 0x182   :  { %606 = vrsqrt.f32 %v416_v51  ;;  %v197_v60 = vmax.f32 %v193_v53, 0.0  ;;  %v395_v61 = vmul.f32 0.015625, %v385_v56  ;;  %v903_v15 = vmul.f32 0.015625, %v374_v55 }
 0x183   :  { %v438_v56 = vrot.slane %v808_v44, %v437_v36 }
 0x184   :  { %v205_v0 = vadd.f32 1e-05, %v197_v60  ;;  %v403_v1 = vsub.f32 %v395_v61, %v399_v59  ;;  %v402_v30 = vmul.f32 %v903_v15, %v903_v15  ;;  %v201_v59 = vsub.f32 %v816_v52, %v874_v32 }
 0x185   :  { %v160_v4 = vpop.xlane.xlu1 %159  ;;  %v371_v5 = vpop.xlane.xlu0 %370  ;;  %v411_v52 = vsub.f32 %v825_v58, %v881_v47  ;;  %v35_v47 = vmul.f32 %v887_v57, %v27_v12  ;;  %v414_v22 = vsub.f32 %v838_v3, %v903_v15 }
 0x186   :  { %608 = vrsqrt.f32 %v205_v0  ;;  %v407_v6 = vmax.f32 %v403_v1, 0.0  ;;  %v895_v7 = vmul.f32 0.015625, %v160_v4  ;;  %v905_v16 = vmul.f32 0.015625, %v371_v5  ;;  %v28_v4 = vld [vmem:[%s984_s0 + $0x18] sm:$0xff]  ;;  %s644_s0 = smov [#allocation2]  }
 0x187   :  { %40 = vst.msk [vmem:[#allocation2 + $0x20] sm:$0xff] %vm37_vm1, %v35_v47  ;;  %s473_s12 = sshll.u32 %s644_s0, 4  ;;  %s474_s12 = int_to_ptr.vmem [resolvable:$true] %s473_s12 }
 0x188   :  { %v415_v9 = vadd.f32 1e-05, %v407_v6  ;;  %v191_v19 = vmul.f32 %v895_v7, %v895_v7  ;;  %v401_v31 = vmul.f32 %v905_v16, %v905_v16  ;;  %v36_v6 = vmul.f32 %v887_v57, %v28_v4  ;;  %s620_s13 = scalar_lea.vmem %s474_s12, 1024  ;;  %p625_p1 = scmp.lt.s32.totalorder %s474_s12, %s474_s12 }
 0x189   :  { %v184_v17 = vpop.xlane.xlu1 %183  ;;  %v181_v18 = vpop.xlane.xlu0 %180  ;;  %v413_v24 = vsub.f32 %v849_v11, %v905_v16  ;;  %p621_p0 = scmp.ne.s32.totalorder %s474_s12, %s620_s13  ;;  %p626_p2 = scmp.lt.s32.totalorder %s620_s13, %s620_s13 }
 0x18a   :  { %610 = vrsqrt.f32 %v415_v9  ;;  %v188_v20 = vmul.f32 0.015625, %v184_v17  ;;  %v187_v21 = vmul.f32 0.015625, %v181_v18  ;;  %41 = vst.msk [vmem:[#allocation2 + $0x30] sm:$0xff] %vm37_vm1, %v36_v6  ;;  %v203_v18 = vsub.f32 %v847_v10, %v895_v7 }
 0x18b   :  { %v605_v49 = vpop.eup %604  ;;  %p627_p3 = por %p626_p2, %p625_p1 }
 0x18c   :  { %v196_v26 = vsub.f32 %v188_v20, %v192_v14  ;;  %v195_v27 = vsub.f32 %v187_v21, %v191_v19  ;;  %v214_v28 = vmul.f32 %v605_v49, %v202_v13  ;;  %v204_v14 = vsub.f32 %v831_v62, %v892_v2 }
 0x18d   :  { %v394_v33 = vpop.xlane.xlu1 %393  ;;  %v391_v34 = vpop.xlane.xlu0 %390  ;;  %p628_p4 = pnand %p627_p3, %p621_p0 }
 0x18e   :  { %v200_v37 = vmax.f32 %v196_v26, 0.0  ;;  %v199_v38 = vmax.f32 %v195_v27, 0.0  ;;  %v398_v39 = vmul.f32 0.015625, %v394_v33  ;;  %v397_v40 = vmul.f32 0.015625, %v391_v34 }
 0x18f   :  { %v607_v42 = vpop.eup %606  ;;  %v222_v45 = vmul.f32 %v913_v23, %v214_v28 }
 0x190   :  { %v208_v48 = vadd.f32 1e-05, %v200_v37  ;;  %v207_v51 = vadd.f32 1e-05, %v199_v38  ;;  %v406_v53 = vsub.f32 %v398_v39, %v402_v30  ;;  %v405_v54 = vsub.f32 %v397_v40, %v401_v31 }
 0x191   :  { %v230_v41 = vadd.f32 %v922_v35, %v222_v45  ;;  %v424_v55 = vmul.f32 %v607_v42, %v412_v43 }
 0x192   :  { %612 = vrsqrt.f32 %v208_v48  ;;  %v410_v60 = vmax.f32 %v406_v53, 0.0  ;;  %v409_v61 = vmax.f32 %v405_v54, 0.0 }
 0x193   :  { %v609_v50 = vpop.eup %608  ;;  %614 = vrsqrt.f32 %v207_v51  ;;  %239 = vrot.lane.b32.xlu1 %v230_v41, %s642_s30  ;;  %v432_v29 = vmul.f32 %v430_v46, %v424_v55 }
 0x194   :  { %v418_v63 = vadd.f32 1e-05, %v410_v60  ;;  %v417_v0 = vadd.f32 1e-05, %v409_v61  ;;  %v213_v1 = vmul.f32 %v609_v50, %v201_v59 }
 0x195   :  { %v440_v44 = vadd.f32 %v438_v56, %v432_v29 }
 0x196   :  { %616 = vrsqrt.f32 %v418_v63  ;;  %v221_v32 = vmul.f32 %v913_v23, %v213_v1 }
 0x197   :  { %v611_v5 = vpop.eup %610  ;;  %618 = vrsqrt.f32 %v417_v0  ;;  %449 = vrot.lane.b32.xlu1 %v440_v44, %s643_s9 }
 0x198   :  { %v229_v8 = vadd.f32 %v922_v35, %v221_v32  ;;  %v423_v9 = vmul.f32 %v611_v5, %v411_v52 }
 0x19a   :  { %237 = vrot.lane.b32.xlu0 %v229_v8, %s642_s30  ;;  %v431_v58 = vmul.f32 %v430_v46, %v423_v9 }
 0x19c   :  { %v439_v13 = vadd.f32 %v438_v56, %v431_v58 }
 0x19e   :  { %447 = vrot.lane.b32.xlu0 %v439_v13, %s643_s9 }
 0x19f   :  { %v613_v17 = vpop.eup %612 }
 0x1a0   :  { %v615_v19 = vpop.eup %614  ;;  %v216_v20 = vmul.f32 %v613_v17, %v204_v14 }
 0x1a1   :  { %v215_v21 = vmul.f32 %v615_v19, %v203_v18 }
 0x1a2   :  { %v224_v57 = vmul.f32 %v913_v23, %v216_v20 }
 0x1a3   :  { %v617_v49 = vpop.eup %616  ;;  %v223_v2 = vmul.f32 %v913_v23, %v215_v21 }
 0x1a4   :  { %v619_v25 = vpop.eup %618  ;;  %v232_v62 = vadd.f32 %v922_v35, %v224_v57  ;;  %v426_v26 = vmul.f32 %v617_v49, %v414_v22 }
 0x1a5   :  { %v425_v27 = vmul.f32 %v619_v25, %v413_v24  ;;  %v231_v7 = vadd.f32 %v922_v35, %v223_v2 }
 0x1a6   :  { %243 = vrot.lane.b32.xlu1 %v232_v62, %s642_s30  ;;  %v434_v28 = vmul.f32 %v430_v46, %v426_v26 }
 0x1a7   :  { %v433_v10 = vmul.f32 %v430_v46, %v425_v27 }
 0x1a8   :  { %v442_v15 = vadd.f32 %v438_v56, %v434_v28 }
 0x1a9   :  { %v441_v3 = vadd.f32 %v438_v56, %v433_v10 }
 0x1aa   :  { %241 = vrot.lane.b32.xlu1 %v231_v7, %s642_s30 }
 0x1ab   :  { %451 = vrot.lane.b32.xlu0 %v441_v3, %s643_s9 }
 0x1ae   :  { %453 = vrot.lane.b32.xlu1 %v442_v15, %s643_s9 }
 0x205   :  { %v240_v11 = vpop.permute.xlu1 %239 }
 0x206   :  { %251 = vst.msk [vmem:[#allocation2 + $0x10] sm:$0xff] %vm249_vm2, %v240_v11 }
 0x209   :  { %v450_v16 = vpop.permute.xlu1 %449 }
 0x20a   :  { %462 = vst.msk [vmem:[#allocation2 + $0x10] sm:$0xff] %vm459_vm3, %v450_v16 }
 0x20b   :  { %463 = vst.msk [vmem:[#allocation2 + $0x18] sm:$0xff] %vm37_vm1, %v450_v16 }
 0x20c   :  { %v238_v23 = vpop.permute.xlu0 %237 }
 0x20d   :  { %250 = vst.msk [vmem:[#allocation2] sm:$0xff] %vm249_vm2, %v238_v23 }
 0x210   :  { %v448_v30 = vpop.permute.xlu0 %447 }
 0x211   :  { %460 = vst.msk [vmem:[#allocation2] sm:$0xff] %vm459_vm3, %v448_v30 }
 0x212   :  { %461 = vst.msk [vmem:[#allocation2 + $0x8] sm:$0xff] %vm37_vm1, %v448_v30 }
 0x218   :  { %v244_v31 = vpop.permute.xlu1 %243 }
 0x219   :  { %253 = vst.msk [vmem:[#allocation2 + $0x30] sm:$0xff] %vm249_vm2, %v244_v31 }
 0x21c   :  { %v242_v33 = vpop.permute.xlu1 %241 }
 0x21d   :  { %252 = vst.msk [vmem:[#allocation2 + $0x20] sm:$0xff] %vm249_vm2, %v242_v33  ;;  %v452_v34 = vpop.permute.xlu0 %451 }
 0x21e   :  { %464 = vst.msk [vmem:[#allocation2 + $0x20] sm:$0xff] %vm459_vm3, %v452_v34 }
 0x21f   :  { %465 = vst.msk [vmem:[#allocation2 + $0x28] sm:$0xff] %vm37_vm1, %v452_v34 }
 0x220   :  { %v454_v35 = vpop.permute.xlu1 %453 }
 0x221   :  { %466 = vst.msk [vmem:[#allocation2 + $0x30] sm:$0xff] %vm459_vm3, %v454_v35 }
 0x222   :  { %467 = vst.msk [vmem:[#allocation2 + $0x38] sm:$0xff] %vm37_vm1, %v454_v35 }
 0x223   :  { %631 = shalt.err (!%p628_p4)
}
 0x224   :  { %s645_s14 = smov 256  }
 0x225   :  { %479 = dma.vmem_to_hbm [thread:$0]  %s474_s12, 1024, %s990_s6, [#allocation3], %s645_s14, %s645_s14, %s642_s30  }
 0x226   :  { %640 = dma.done.wait [#allocation3], 1024  }
 0x227   :  { %641 = vsyncadd [#allocation3], 4294966272 }
 0x228   :  { %483 = vsyncpa [#allocation3], 1 }

</bundles_post_ra>
